<compile_context>
chip_gen: v7x
topology: tpu7x:2x2x1
jax: 0.10.0
libtpu: 0.0.40
codegen_flags: <defaults>
</compile_context>

<pallas_src>
import functools

import jax
import jax.numpy as jnp
from jax.experimental import pallas as pl
from jax.experimental.pallas import tpu as pltpu


def _round_up(x: int, m: int) -> int:
    return ((x + m - 1) // m) * m


def student_kernel(emb_ref, cnt_ref, w_ref, b_ref, out_ref, mean_ref):
    """Grid = (B tiles, N tiles).  Pool once per batch tile, matmul per N tile."""
    # --- masked mean pooling: only on the first N tile of each batch tile ---
    @pl.when(pl.program_id(1) == 0)
    def _():
        # emb tile is (TB, S, D) bf16; padding positions hold the zero row of
        # the embedding table (padding_idx=0), so a plain sum == masked sum.
        summed = jnp.sum(emb_ref[...].astype(jnp.float32), axis=1)          # (TB, D)
        inv_cnt = pl.reciprocal(cnt_ref[...], approx=True)                  # EUP slot
        mean_ref[...] = summed * inv_cnt                                    # (TB, D) f32

    # --- dense head: lane-dense (TB, TN) MXU matmul, f32 accumulation ---
    logits = jnp.dot(mean_ref[...].astype(jnp.bfloat16), w_ref[...],
                     preferred_element_type=jnp.float32)                    # (TB, TN)
    out_ref[...] = logits + b_ref[...]                                      # bias (1, TN)


def student_forward(x, item_emb, fc_w, fc_b, *, tb=None, tn=None):
    """x: (B, S) int32 item ids (0 = padding). fc_w: (num_items, D) PyTorch layout.

    Returns logits (B, num_items) float32.
    """
    B, S = x.shape
    N, D = fc_w.shape

    # ---- tile sizes: lane-dense N tiles, sublane-aligned B tiles ----
    if tn is None:
        tn = min(_round_up(N, 128), 1024)       # cap TN (VMEM-safe on v7x too)
    if tb is None:
        tb = min(_round_up(B, 8), 256)
    pad_N = _round_up(N, tn)
    pad_B = _round_up(B, tb)
    nb, nn = pad_B // tb, pad_N // tn

    # ---- wrapper-side glue (XLA): gather, count, pad, bf16 casts ----
    emb = jnp.take(item_emb, x, axis=0).astype(jnp.bfloat16)                 # (B, S, D)
    cnt = jnp.maximum(
        jnp.sum((x > 0).astype(jnp.float32), axis=1, keepdims=True), 1.0)    # (B, 1)

    emb = jnp.pad(emb, ((0, pad_B - B), (0, 0), (0, 0)))
    cnt = jnp.pad(cnt, ((0, pad_B - B), (0, 0)), constant_values=1.0)        # avoid 1/0
    w = jnp.pad(fc_w.T.astype(jnp.bfloat16), ((0, 0), (0, pad_N - N)))       # (D, pad_N)
    b = jnp.pad(fc_b.astype(jnp.float32), (0, pad_N - N)).reshape(1, pad_N)  # (1, pad_N)

    # ---- VMEM budget: ~2x (double-buffered tiles) + scratch, with headroom ----
    needed = 2 * (tb * S * D * 2 + tb * 4 + D * tn * 2 + tn * 4 + tb * tn * 4) + tb * D * 4
    vmem_limit = int(min(max(2 * needed, 8 << 20), 48 << 20))

    out = pl.pallas_call(
        student_kernel,
        out_shape=jax.ShapeDtypeStruct((pad_B, pad_N), jnp.float32),
        grid=(nb, nn),
        in_specs=[
            # emb block index only depends on i -> Pallas keeps it resident
            # (no re-DMA) across the inner N-tile loop.
            pl.BlockSpec((tb, S, D), lambda i, j: (i, 0, 0)),
            pl.BlockSpec((tb, 1), lambda i, j: (i, 0)),
            pl.BlockSpec((D, tn), lambda i, j: (0, j)),
            pl.BlockSpec((1, tn), lambda i, j: (0, j)),
        ],
        out_specs=pl.BlockSpec((tb, tn), lambda i, j: (i, j)),
        scratch_shapes=[pltpu.VMEM((tb, D), jnp.float32)],   # cached pooled mean
        compiler_params=pltpu.CompilerParams(
            dimension_semantics=("parallel", "arbitrary"),
            vmem_limit_bytes=vmem_limit,
        ),
    )(emb, cnt, w, b)

    return out[:B, :N]


def reference_forward(x, item_emb, fc_w, fc_b):
    """Pure-JAX f32 reference mirroring the PyTorch forward."""
    emb = jnp.take(item_emb, x, axis=0)                      # (B, S, D)
    mask = (x > 0).astype(jnp.float32)[..., None]
    summed = jnp.sum(emb * mask, axis=1)
    cnt = jnp.maximum(jnp.sum(mask, axis=1), 1.0)
    mean = summed / cnt
    return mean @ fc_w.T + fc_b[None, :]


def _run_case(key, num_items, embedding_dim, B, S, tb=None, tn=None):
    k_x, k_emb, k_w, k_b = jax.random.split(key, 4)

    # Deterministic synthetic parameters (no checkpoint loading).
    item_emb = 0.1 * jax.random.normal(k_emb, (num_items + 1, embedding_dim), jnp.float32)
    item_emb = item_emb.at[0].set(0.0)                       # padding_idx=0 row is zeros
    fc_w = 0.1 * jax.random.normal(k_w, (num_items, embedding_dim), jnp.float32)  # (N, D)
    fc_b = 0.01 * jax.random.normal(k_b, (num_items,), jnp.float32)

    # Item-id sequences with some trailing padding (id 0) to exercise the mask.
    x = jax.random.randint(k_x, (B, S), 1, num_items + 1, dtype=jnp.int32)
    x = x.at[0, S - 2:].set(0)
    x = x.at[B - 1, S - 1:].set(0)

    out = student_forward(x, item_emb, fc_w, fc_b, tb=tb, tn=tn)
    out = jax.block_until_ready(out)

    ref = reference_forward(x, item_emb, fc_w, fc_b)
    assert out.shape == (B, num_items)
    # bf16 weights/embeddings + approx reciprocal -> relaxed tolerance.
    assert jnp.allclose(out, ref, atol=2e-3, rtol=2e-2), (
        f"max abs diff = {jnp.max(jnp.abs(out - ref))}")


if __name__ == "__main__":
    base_key = jax.random.PRNGKey(0)

    # Small toy config consistent with the module: B=2, S=8, D=32, 64 items
    # (N padded to 128 lanes, B padded to 8 sublanes -> single-tile grid).
    _run_case(jax.random.fold_in(base_key, 0),
              num_items=64, embedding_dim=32, B=2, S=8)

    # Multi-tile config exercising the 2-D grid, scratch reuse across N tiles,
    # and edge padding: grid = (2 batch tiles, 3 N tiles).
    _run_case(jax.random.fold_in(base_key, 1),
              num_items=300, embedding_dim=32, B=10, S=8, tb=8, tn=128)

    print("KERNEL_OK")
</pallas_src>

<mosaic_0001>
module attributes {stable_mosaic.version = 11 : i64} {
  func.func @student_kernel(%arg0: i32, %arg1: i32, %arg2: memref<8x8x32xbf16, #tpu.memory_space<vmem>>, %arg3: memref<8x1xf32, #tpu.memory_space<vmem>>, %arg4: memref<32x128xbf16, #tpu.memory_space<vmem>>, %arg5: memref<1x128xf32, #tpu.memory_space<vmem>>, %arg6: memref<8x128xf32, #tpu.memory_space<vmem>>, %arg7: memref<8x32xf32, #tpu.memory_space<vmem>>) attributes {dimension_semantics = [#tpu.dimension_semantics<parallel>, #tpu.dimension_semantics<arbitrary>], iteration_bounds = array<i64: 1, 1>, scalar_prefetch = 0 : i64, scratch_operands = 1 : i64, tpu.core_type = #tpu.core_type<tc>, window_params = [{transform_indices = @transform_0, window_bounds = array<i64: 8, 8, 32>}, {transform_indices = @transform_1, window_bounds = array<i64: 8, 1>}, {transform_indices = @transform_2, window_bounds = array<i64: 32, 128>}, {transform_indices = @transform_3, window_bounds = array<i64: 1, 128>}, {transform_indices = @transform_4, window_bounds = array<i64: 8, 128>}]} {
    %c0_i32 = arith.constant 0 : i32
    %0 = arith.cmpi eq, %arg1, %c0_i32 : i32
    %1 = arith.extui %0 : i1 to i32
    %c0_i32_0 = arith.constant 0 : i32
    %2 = arith.cmpi ne, %1, %c0_i32_0 : i32
    scf.if %2 {
      %c0_8 = arith.constant 0 : index
      %c0_9 = arith.constant 0 : index
      %c0_10 = arith.constant 0 : index
      %11 = vector.load %arg2[%c0_8, %c0_9, %c0_10] : memref<8x8x32xbf16, #tpu.memory_space<vmem>>, vector<8x8x32xbf16>
      %12 = arith.extf %11 : vector<8x8x32xbf16> to vector<8x8x32xf32>
      %cst_11 = arith.constant dense<0.000000e+00> : vector<8x32xf32>
      %13 = vector.multi_reduction <add>, %12, %cst_11 [1] : vector<8x8x32xf32> to vector<8x32xf32>
      %c0_12 = arith.constant 0 : index
      %c0_13 = arith.constant 0 : index
      %14 = vector.load %arg3[%c0_12, %c0_13] : memref<8x1xf32, #tpu.memory_space<vmem>>, vector<8x1xf32>
      %15 = tpu.reciprocal %14 {approx = true} : vector<8x1xf32> -> vector<8x1xf32>
      %16 = vector.broadcast %15 : vector<8x1xf32> to vector<8x32xf32>
      %17 = arith.mulf %13, %16 : vector<8x32xf32>
      %c0_14 = arith.constant 0 : index
      %c0_15 = arith.constant 0 : index
      %18 = vector.load %arg7[%c0_14, %c0_15] : memref<8x32xf32, #tpu.memory_space<vmem>>, vector<8x32xf32>
      tpu.vector_store %arg7[%c0_14, %c0_15], %17 {strides = array<i32>} : memref<8x32xf32, #tpu.memory_space<vmem>>, vector<8x32xf32>,
    } else {
    }
    %c0 = arith.constant 0 : index
    %c0_1 = arith.constant 0 : index
    %3 = vector.load %arg7[%c0, %c0_1] : memref<8x32xf32, #tpu.memory_space<vmem>>, vector<8x32xf32>
    %4 = arith.truncf %3 : vector<8x32xf32> to vector<8x32xbf16>
    %c0_2 = arith.constant 0 : index
    %c0_3 = arith.constant 0 : index
    %5 = vector.load %arg4[%c0_2, %c0_3] : memref<32x128xbf16, #tpu.memory_space<vmem>>, vector<32x128xbf16>
    %cst = arith.constant dense<0.000000e+00> : vector<8x128xf32>
    %6 = tpu.matmul %4, %5, %cst {dimension_numbers = #tpu.dot_dimension_numbers<[1], [0], [0], [1], [0, 0, 1, 1], [], []>} : vector<8x32xbf16>, vector<32x128xbf16>, vector<8x128xf32> -> vector<8x128xf32>
    %c0_4 = arith.constant 0 : index
    %c0_5 = arith.constant 0 : index
    %7 = vector.load %arg5[%c0_4, %c0_5] : memref<1x128xf32, #tpu.memory_space<vmem>>, vector<1x128xf32>
    %8 = vector.broadcast %7 : vector<1x128xf32> to vector<8x128xf32>
    %9 = arith.addf %6, %8 : vector<8x128xf32>
    %c0_6 = arith.constant 0 : index
    %c0_7 = arith.constant 0 : index
    %10 = vector.load %arg6[%c0_6, %c0_7] : memref<8x128xf32, #tpu.memory_space<vmem>>, vector<8x128xf32>
    tpu.vector_store %arg6[%c0_6, %c0_7], %9 {strides = array<i32>} : memref<8x128xf32, #tpu.memory_space<vmem>>, vector<8x128xf32>,
    return
  }
  func.func @transform_0(%arg0: i32, %arg1: i32) -> (i32, i32, i32) {
    %c0_i32 = arith.constant 0 : i32
    %c0_i32_0 = arith.constant 0 : i32
    %c0_i32_1 = arith.constant 0 : i32
    return %arg0, %c0_i32, %c0_i32_0 : i32, i32, i32
  }
  func.func @transform_1(%arg0: i32, %arg1: i32) -> (i32, i32) {
    %c0_i32 = arith.constant 0 : i32
    %c0_i32_0 = arith.constant 0 : i32
    return %arg0, %c0_i32 : i32, i32
  }
  func.func @transform_2(%arg0: i32, %arg1: i32) -> (i32, i32) {
    %c0_i32 = arith.constant 0 : i32
    %c0_i32_0 = arith.constant 0 : i32
    return %c0_i32, %arg1 : i32, i32
  }
  func.func @transform_3(%arg0: i32, %arg1: i32) -> (i32, i32) {
    %c0_i32 = arith.constant 0 : i32
    %c0_i32_0 = arith.constant 0 : i32
    return %c0_i32, %arg1 : i32, i32
  }
  func.func @transform_4(%arg0: i32, %arg1: i32) -> (i32, i32) {
    %c0_i32 = arith.constant 0 : i32
    return %arg0, %arg1 : i32, i32
  }
}

</mosaic_0001>

<bundles_post_ra>
// kernel: tpu_custom_call.1
= control target key start
LH: loop header
LB: loop body
LE: loop exit
PB: predicated region body
PF: predicated region fallthrough
CT: control target
= control target key end

     0   :  { %9 = vsyncpa [#allocation4], 0  ;;  %s427_s0 = inlined_call_operand.hbm [shape: bf16[8,8,32], index: 0, kind: input, shape index: {}]   ;;  %s428_s1 = inlined_call_operand.vmem [shape: f32[8,1], index: 1, kind: input, shape index: {}]   ;;  %s429_s2 = inlined_call_operand.vmem [shape: bf16[32,128], index: 2, kind: input, shape index: {}]   ;;  %s430_s3 = inlined_call_operand.vmem [shape: f32[1,128], index: 3, kind: input, shape index: {}]   ;;  %s431_s4 = inlined_call_operand.hbm [shape: f32[8,128], index: 4, kind: output, shape index: {}]  }
   0x1   :  { %10 = vsyncpa [#allocation5], 0  ;;  %s349_s15 = smov [#allocation3]   ;;  %s301_s19 = scalar_lea.hbm %s427_s0, 512 }
   0x2   :  { %s16_s16 = sshll.u32 %s349_s15, 4  ;;  %p302_p0 = scmp.ne.s32.totalorder %s427_s0, %s301_s19  ;;  %s17_s16 = int_to_ptr.vmem [resolvable:$true] %s16_s16 }
   0x3   :  { %p305_p1 = scmp.lt.u32.totalorder %s301_s19, %s427_s0 }
   0x5   :  { %p307_p2 = pnand %p305_p1, %p302_p0 }
   0x7   :  { %310 = shalt.err (!%p307_p2)
}
   0x8   :  { %s311_s24 = scalar_lea.vmem %s17_s16, 512  ;;  %p316_p4 = scmp.lt.s32.totalorder %s17_s16, %s17_s16 }
   0x9   :  { %p312_p3 = scmp.ne.s32.totalorder %s17_s16, %s311_s24  ;;  %p317_p5 = scmp.lt.s32.totalorder %s311_s24, %s311_s24 }
   0xb   :  { %p318_p6 = por %p317_p5, %p316_p4 }
   0xd   :  { %p319_p7 = pnand %p318_p6, %p312_p3 }
   0xf   :  { %322 = shalt.err (!%p319_p7)
}
  0x10   :  { %s350_s25 = smov 64   ;;  %s351_s26 = smov 4  }
  0x11   :  { %22 = dma.hbm_to_vmem [thread:$0]  %s427_s0, 512, %s17_s16, [#allocation4], %s350_s25, %s350_s25, %s351_s26  }
  0x12   :  { %345 = dma.done.wait [#allocation4], 512  }
  0x13   :  { %346 = vsyncadd [#allocation4], 4294966784  ;;  %v352_v0 = vmov 0   ;;  %v110_v1 = vld [vmem:[%s428_s1] sm:$0xff]  ;;  %v353_v4 = vmov 0.0   ;;  %vm354_vm0 = vmmov 0  }
  0x14   :  { %296 = vset.pattern.permute.xlu0 %v352_v0  ;;  %299 = vrcp.f32 %v110_v1  ;;  %v297_v3 = vld [vmem:[%s429_s2] sm:$0xff]   ;;  %281 = vmatprep.subr.bf16.mxu0 %v353_v4  ;;  %v298_v5 = vld [vmem:[%s429_s2 + $0x8] sm:$0xff]   ;;  %v275_v6 = vld [vmem:[#allocation3 + $0x8] sm:$0xff]   ;;  %vm53_vm1 = vcmask 261120   ;;  %vm148_vm2 = vcmask 1041409   ;;  %vm151_vm3 = vcmask 1042434  }
  0x15   :  { %285 = vmatprep.mubr.msk.bf16.mxu0 %vm354_vm0, %v353_v4  ;;  %282 = vmatpush3.bf16.msra.mxu0 %v297_v3  ;;  %v260_v7 = vld [vmem:[#allocation3] sm:$0xff]   ;;  %v276_v8 = vld [vmem:[#allocation3 + $0x10] sm:$0xff]   ;;  %v265_v10 = vunpack.c.l.bf16 %v275_v6  ;;  %v266_v11 = vunpack.c.h.bf16 %v275_v6  ;;  %v277_v12 = vld [vmem:[#allocation3 + $0x18] sm:$0xff]   ;;  %vm154_vm4 = vcmask 1043459   ;;  %vm157_vm5 = vcmask 1044484   ;;  %s355_s8 = smov [#allocation6]  }
  0x16   :  { %283 = vmatprep.subr.bf16.mxu0 %v353_v4  ;;  %v262_v9 = vunpack.c.h.bf16 %v260_v7  ;;  %v261_v13 = vunpack.c.l.bf16 %v260_v7  ;;  %v269_v14 = vunpack.c.l.bf16 %v276_v8  ;;  %v270_v15 = vunpack.c.h.bf16 %v276_v8  ;;  %s246_s9 = sshll.u32 %s355_s8, 4  ;;  %s247_s9 = int_to_ptr.vmem [resolvable:$true] %s246_s9 }
  0x17   :  { %v273_v16 = vunpack.c.l.bf16 %v277_v12  ;;  %v274_v17 = vunpack.c.h.bf16 %v277_v12  ;;  %v68_v19 = vsel %vm53_vm1, %v265_v10, 0.0  ;;  %v75_v20 = vsel %vm53_vm1, %v266_v11, 0.0  ;;  %s323_s10 = scalar_lea.vmem %s247_s9, 128  ;;  %p328_p9 = scmp.lt.s32.totalorder %s247_s9, %s247_s9 }
  0x18   :  { %v61_v18 = vsel %vm53_vm1, %v262_v9, 0.0  ;;  %v54_v21 = vsel %vm53_vm1, %v261_v13, 0.0  ;;  %v82_v22 = vsel %vm53_vm1, %v269_v14, 0.0  ;;  %v89_v23 = vsel %vm53_vm1, %v270_v15, 0.0  ;;  %p324_p8 = scmp.ne.s32.totalorder %s247_s9, %s323_s10  ;;  %p329_p10 = scmp.lt.s32.totalorder %s323_s10, %s323_s10 }
  0x19   :  { %284 = vmatpush3.bf16.msra.mxu0 %v298_v5  ;;  %v62_v24 = vrot.slane %v61_v18, 4  ;;  %v69_v25 = vrot.slane %v68_v19, 4  ;;  %v76_v26 = vrot.slane %v75_v20, 4  ;;  %v96_v27 = vsel %vm53_vm1, %v273_v16, 0.0 }
  0x1a   :  { %v103_v28 = vsel %vm53_vm1, %v274_v17, 0.0  ;;  %v55_v29 = vrot.slane %v54_v21, 4  ;;  %v83_v30 = vrot.slane %v82_v22, 4  ;;  %v90_v31 = vrot.slane %v89_v23, 4  ;;  %p330_p11 = por %p329_p10, %p328_p9 }
  0x1b   :  { %v97_v32 = vrot.slane %v96_v27, 4  ;;  %v104_v33 = vrot.slane %v103_v28, 4  ;;  %v63_v34 = vadd.f32 %v62_v24, %v61_v18  ;;  %v70_v35 = vadd.f32 %v69_v25, %v68_v19 }
  0x1c   :  { %v77_v36 = vadd.f32 %v76_v26, %v75_v20  ;;  %v56_v37 = vadd.f32 %v55_v29, %v54_v21  ;;  %v84_v38 = vadd.f32 %v83_v30, %v82_v22  ;;  %v91_v39 = vadd.f32 %v90_v31, %v89_v23  ;;  %p331_p12 = pnand %p330_p11, %p324_p8 }
  0x1d   :  { %v98_v40 = vadd.f32 %v97_v32, %v96_v27  ;;  %v105_v41 = vadd.f32 %v104_v33, %v103_v28  ;;  %v64_v42 = vrot.slane %v63_v34, 2  ;;  %v71_v43 = vrot.slane %v70_v35, 2 }
  0x1e   :  { %v300_v2 = vpop.eup %299  ;;  %v78_v44 = vrot.slane %v77_v36, 2  ;;  %v57_v45 = vrot.slane %v56_v37, 2  ;;  %v85_v46 = vrot.slane %v84_v38, 2  ;;  %v92_v47 = vrot.slane %v91_v39, 2 }
  0x1f   :  { %114 = vperm.xlu0 %296, %v300_v2   ;;  %v99_v48 = vrot.slane %v98_v40, 2  ;;  %v106_v49 = vrot.slane %v105_v41, 2  ;;  %v65_v50 = vadd.f32 %v64_v42, %v63_v34  ;;  %v72_v51 = vadd.f32 %v71_v43, %v70_v35  ;;  %v255_v42 = vld [vmem:[%s430_s3] ss:$0 sm:$0xff] }
  0x20   :  { %v79_v52 = vadd.f32 %v78_v44, %v77_v36  ;;  %v58_v53 = vadd.f32 %v57_v45, %v56_v37  ;;  %v86_v54 = vadd.f32 %v85_v46, %v84_v38  ;;  %v93_v55 = vadd.f32 %v92_v47, %v91_v39 }
  0x21   :  { %v100_v56 = vadd.f32 %v99_v48, %v98_v40  ;;  %v107_v57 = vadd.f32 %v106_v49, %v105_v41  ;;  %v66_v58 = vrot.slane %v65_v50, 1  ;;  %v73_v59 = vrot.slane %v72_v51, 1 }
  0x22   :  { %v80_v60 = vrot.slane %v79_v52, 1  ;;  %v59_v61 = vrot.slane %v58_v53, 1  ;;  %v87_v62 = vrot.slane %v86_v54, 1  ;;  %v94_v63 = vrot.slane %v93_v55, 1 }
  0x23   :  { %v101_v0 = vrot.slane %v100_v56, 1  ;;  %v108_v1 = vrot.slane %v107_v57, 1  ;;  %v67_v2 = vadd.f32 %v66_v58, %v65_v50  ;;  %v74_v3 = vadd.f32 %v73_v59, %v72_v51 }
  0x24   :  { %v81_v4 = vadd.f32 %v80_v60, %v79_v52  ;;  %v60_v6 = vadd.f32 %v59_v61, %v58_v53  ;;  %v88_v7 = vadd.f32 %v87_v62, %v86_v54  ;;  %v95_v8 = vadd.f32 %v94_v63, %v93_v55 }
  0x25   :  { %v102_v13 = vadd.f32 %v101_v0, %v100_v56  ;;  %v109_v14 = vadd.f32 %v108_v1, %v107_v57  ;;  %vm160_vm6 = vcmask 1045509   ;;  %vm163_vm7 = vcmask 1046534  }
  0x26   :  { %vm166_vm8 = vcmask 1047559  }
  0x9e   :  { %v115_v5 = vpop.permute.xlu0 %114 }
  0x9f   :  { %v116_v9 = vrot.slane %v115_v5, 1  ;;  %v117_v10 = vrot.slane %v115_v5, 2  ;;  %v118_v11 = vrot.slane %v115_v5, 3  ;;  %v119_v12 = vrot.slane %v115_v5, 4 }
  0xa0   :  { %v120_v15 = vrot.slane %v115_v5, 5  ;;  %v121_v16 = vrot.slane %v115_v5, 6  ;;  %v122_v17 = vrot.slane %v115_v5, 7  ;;  %v131_v22 = vmul.f32 %v115_v5, %v60_v6 }
  0xa1   :  { %v132_v18 = vmul.f32 %v116_v9, %v67_v2  ;;  %v133_v19 = vmul.f32 %v117_v10, %v74_v3  ;;  %v134_v20 = vmul.f32 %v118_v11, %v81_v4  ;;  %v135_v21 = vmul.f32 %v119_v12, %v88_v7 }
  0xa2   :  { %v136_v23 = vmul.f32 %v120_v15, %v95_v8  ;;  %v137_v26 = vmul.f32 %v121_v16, %v102_v13  ;;  %v138_v27 = vmul.f32 %v122_v17, %v109_v14 }
  0xa3   :  { %v147_v24 = vrot.slane %v132_v18, 7  ;;  %v150_v25 = vrot.slane %v133_v19, 6  ;;  %v153_v29 = vrot.slane %v134_v20, 5  ;;  %v156_v31 = vrot.slane %v135_v21, 4 }
  0xa4   :  { %v159_v33 = vrot.slane %v136_v23, 3  ;;  %v162_v35 = vrot.slane %v137_v26, 2  ;;  %v165_v37 = vrot.slane %v138_v27, 1 }
  0xa5   :  { %v149_v28 = vsel %vm148_vm2, %v147_v24, %v131_v22 }
  0xa6   :  { %v152_v30 = vsel %vm151_vm3, %v150_v25, %v149_v28 }
  0xa7   :  { %v155_v32 = vsel %vm154_vm4, %v153_v29, %v152_v30 }
  0xa8   :  { %v158_v34 = vsel %vm157_vm5, %v156_v31, %v155_v32 }
  0xa9   :  { %v161_v36 = vsel %vm160_vm6, %v159_v33, %v158_v34 }
  0xaa   :  { %v164_v38 = vsel %vm163_vm7, %v162_v35, %v161_v36 }
  0xab   :  { %v167_v39 = vsel %vm166_vm8, %v165_v37, %v164_v38 }
  0xac   :  { %169 = vst.msk [vmem:[#allocation2] sm:$0xff] %vm53_vm1, %v167_v39 }
  0xb3   :  { %v170_v40 = vld [vmem:[#allocation2] sm:$0xff] }
  0xb4   :  { %v171_v41 = vpack.c.bf16 %v170_v40, %v170_v40 }
  0xb6   :  { %286 = vmatmul.mubr.msk.bf16.vlgmr.msra.gmra.mrb[0].mxu0 %vm53_vm1, %v171_v41 }
 0x189   :  { %v233_v43 = vpop.f32.mrb[0].mxu0 }
 0x18a   :  { %v234_v44 = vadd.f32 %v255_v42, %v233_v43  ;;  %v287_v45 = vpop.f32.mrb[1].mxu0 }
 0x18b   :  { %v236_v46 = vpop.f32.mrb[2].mxu0 }
 0x18c   :  { %239 = vst [vmem:[#allocation6] sm:$0xff] %v234_v44  ;;  %v288_v47 = vpop.f32.mrb[3].mxu0 }
 0x18d   :  { %334 = shalt.err (!%p331_p12)
}
 0x18e   :  { %s335_s3 = scalar_lea.hbm %s431_s4, 128 }
 0x18f   :  { %p336_p13 = scmp.ne.s32.totalorder %s431_s4, %s335_s3  ;;  %p339_p0 = scmp.lt.u32.totalorder %s335_s3, %s431_s4 }
 0x191   :  { %p341_p1 = pnand %p339_p0, %p336_p13 }
 0x193   :  { %344 = shalt.err (!%p341_p1)
}
 0x194   :  { %249 = dma.vmem_to_hbm [thread:$0]  %s247_s9, 128, %s431_s4, [#allocation5]  }
 0x195   :  { %347 = dma.done.wait [#allocation5], 128  }
 0x196   :  { %348 = vsyncadd [#allocation5], 4294967168 }
 0x197   :  { %253 = vsyncpa [#allocation4], 1 }
 0x198   :  { %254 = vsyncpa [#allocation5], 1 }

</bundles_post_ra>
